<compile_context>
chip_gen: v5e
topology: v5e:2x2
jax: 0.10.0
libtpu: 0.0.40
codegen_flags: <defaults>
</compile_context>

<pallas_src>
import math
from functools import partial

import jax
import jax.numpy as jnp
from jax.experimental import pallas as pl
from jax.experimental.pallas import tpu as pltpu


# ---------------------------------------------------------------------------
# Kernel
# ---------------------------------------------------------------------------
def _mtan_kernel(q_ref, k_ref, v_ref,
                 wq_ref, bq_ref, wk_ref, bk_ref, wo_ref, bo_ref,
                 o_ref, *, num_heads, batch_block, lq, lk, d_k):
    G, Lq, Lk = batch_block, lq, lk
    NHp = o_ref.shape[-1]                 # lane-dense (128-multiple) output width
    in_dtype = q_ref.dtype

    # Streamed blocks stay in their input dtype (bf16-native MXU path);
    # all accumulation is f32 via preferred_element_type.
    q2 = q_ref[...]                       # (G*Lq, E)
    k2 = k_ref[...]                       # (G*Lk, E)
    v2 = v_ref[...]                       # (G*Lk, D)

    # One full-width (E x E) projection matmul each (instead of H matmuls with
    # N=d_k << MXU tile).  The 1/sqrt(d_k) scale is folded into wq/bq.
    Qf = jnp.dot(q2, wq_ref[...], preferred_element_type=jnp.float32) \
        + bq_ref[...].astype(jnp.float32)                       # (G*Lq, E) f32
    Kf = jnp.dot(k2, wk_ref[...], preferred_element_type=jnp.float32) \
        + bk_ref[...].astype(jnp.float32)                       # (G*Lk, E) f32

    acc = jnp.zeros((G, Lq, NHp), jnp.float32)
    for h in range(num_heads):            # H is small (1-4) for mTAN
        # Head split = static lane slice + leading-dim reshape (no transposes).
        Qh = Qf[:, h * d_k:(h + 1) * d_k].astype(in_dtype).reshape(G, Lq, d_k)
        Kh = Kf[:, h * d_k:(h + 1) * d_k].astype(in_dtype).reshape(G, Lk, d_k)

        # Batched scores; contraction on the last dim of both operands.
        s = jnp.einsum('gqd,gkd->gqk', Qh, Kh,
                       preferred_element_type=jnp.float32)      # (G, Lq, Lk)

        # Softmax over the key axis (f32 math; EUP reciprocal + 1 Newton step
        # so the approximation does not limit accuracy).
        s = s - jnp.max(s, axis=-1, keepdims=True)
        p = jnp.exp(s)
        denom = jnp.sum(p, axis=-1, keepdims=True)
        r = pl.reciprocal(denom, approx=True)
        r = r * (2.0 - denom * r)
        p = (p * r).astype(in_dtype)

        # Reassociated output projection: p_h @ (V @ Wo_h).
        # V@Wo_h is one lane-dense (NHp-wide) matmul hoisted out of the query
        # dimension; the PV matmul then writes straight into NHp lanes instead
        # of D (<128) lanes followed by a second K=D matmul.
        vw = jnp.dot(v2, wo_ref[h], preferred_element_type=jnp.float32)
        vw = vw.astype(in_dtype).reshape(G, Lk, NHp)
        acc = acc + jnp.einsum('gqk,gkn->gqn', p, vw,
                               preferred_element_type=jnp.float32)

    out = acc.reshape(G * Lq, NHp) + bo_ref[...].astype(jnp.float32)
    o_ref[...] = out.astype(o_ref.dtype)


# ---------------------------------------------------------------------------
# Wrapper helpers
# ---------------------------------------------------------------------------
def _round_up(x, m):
    return ((x + m - 1) // m) * m


def _vmem_limit_bytes():
    """Explicit scoped-VMEM limit: ~48 MiB on v7x, ~96-100 MiB on v5e/v6e."""
    try:
        cap = int(pltpu.get_tpu_info().vmem_capacity_bytes)
    except Exception:
        cap = 64 * 1024 * 1024            # v7x physical VMEM; safe floor everywhere
    return min(int(cap * 0.75), 100 * 1024 * 1024)


def _vmem_bytes_estimate(G, Lq, Lk, E, D, NHp, H, itemsize):
    f32 = 4
    # double-buffered streamed blocks (q, k, v, out)
    streamed = 2 * itemsize * (G * Lq * E + G * Lk * E + G * Lk * D + G * Lq * NHp)
    # weight operands (double-buffered by the default pipeliner)
    weights = 2 * itemsize * (2 * E * E + 2 * E + H * D * NHp + NHp)
    # f32 live intermediates inside the body
    interm = f32 * (G * Lq * E + G * Lk * E        # Qf, Kf
                    + 3 * G * Lq * Lk              # scores / p (+ slack)
                    + G * Lk * NHp                 # V @ Wo_h
                    + 2 * G * Lq * NHp)            # accumulator + store staging
    return streamed + weights + interm


def _pick_batch_block(B, Lq, Lk, E, D, NHp, H, itemsize, budget):
    """Largest batch block whose working set fits the VMEM budget; prefers
    >=2 grid steps (v7x has two TensorCores) when the block stays large."""
    divisors = [g for g in range(B, 0, -1) if B % g == 0]
    legal = [g for g in divisors
             if g == B or ((g * Lq) % 8 == 0 and (g * Lk) % 8 == 0)]
    if not legal:
        legal = [B]

    def est(g):
        return _vmem_bytes_estimate(g, Lq, Lk, E, D, NHp, H, itemsize)

    fitting = [g for g in legal if est(g) <= budget]
    if not fitting:
        return min(legal, key=est)
    G = max(fitting)
    if G == B and B > 1:
        target_rows = min(512, (B * Lq) // 2)
        smaller = [g for g in fitting if g < B and g * Lq >= target_rows]
        if smaller:
            G = max(smaller)
    return G


# ---------------------------------------------------------------------------
# Public forward
# ---------------------------------------------------------------------------
def multi_time_attention(query, key, value, params, *, num_heads, batch_block=None):
    """Pallas forward of multiTimeAttention (mask=None, dropout=None)."""
    B, Lq, E = query.shape
    Bv, Lk, D = value.shape
    assert Bv == B and key.shape == (B, Lk, E)
    assert E % num_heads == 0
    d_k = E // num_heads

    wq, bq, wk, bk, wo, bo = params
    nhidden = wo.shape[-1]
    assert wo.shape[0] == num_heads * D

    # Lane-dense output store: pad nhidden to a 128-multiple, slice afterwards.
    NHp = _round_up(nhidden, 128)

    itemsize = jnp.dtype(query.dtype).itemsize
    vmem_limit = _vmem_limit_bytes()
    budget = int(vmem_limit * 0.8)

    if batch_block is None:
        G = _pick_batch_block(B, Lq, Lk, E, D, NHp, num_heads, itemsize, budget)
    else:
        G = batch_block
    assert B % G == 0
    assert G == B or ((G * Lq) % 8 == 0 and (G * Lk) % 8 == 0), (
        "block sublane dims must be multiples of 8; pad Lq/Lk or use batch_block=B")
    n_blocks = B // G

    est = _vmem_bytes_estimate(G, Lq, Lk, E, D, NHp, num_heads, itemsize)
    vmem_limit = max(vmem_limit, int(est * 1.25))

    # Wrapper-side parameter prep (cheap XLA ops, done once outside the kernel).
    inv_sqrt_dk = 1.0 / math.sqrt(d_k)
    wq_s = (wq * inv_sqrt_dk).astype(wq.dtype)     # fold scale into Q projection
    bq_s = (bq * inv_sqrt_dk).astype(bq.dtype)
    wo_h = wo.reshape(num_heads, D, nhidden)       # head-major output weights
    if NHp != nhidden:
        wo_h = jnp.pad(wo_h, ((0, 0), (0, 0), (0, NHp - nhidden)))
        bo_p = jnp.pad(bo, ((0, 0), (0, NHp - nhidden)))
    else:
        bo_p = bo

    # 2-D row slabs for the streamed activations.
    q2 = query.reshape(B * Lq, E)
    k2 = key.reshape(B * Lk, E)
    v2 = value.reshape(B * Lk, D)

    kernel = partial(_mtan_kernel, num_heads=num_heads, batch_block=G,
                     lq=Lq, lk=Lk, d_k=d_k)

    def full(a):
        return pl.BlockSpec(a.shape, lambda i, nd=a.ndim: (0,) * nd)

    out_pad = pl.pallas_call(
        kernel,
        out_shape=jax.ShapeDtypeStruct((B * Lq, NHp), query.dtype),
        grid_spec=pltpu.PrefetchScalarGridSpec(
            num_scalar_prefetch=0,
            grid=(n_blocks,),
            in_specs=[
                pl.BlockSpec((G * Lq, E), lambda i: (i, 0)),
                pl.BlockSpec((G * Lk, E), lambda i: (i, 0)),
                pl.BlockSpec((G * Lk, D), lambda i: (i, 0)),
                full(wq_s), full(bq_s),
                full(wk), full(bk),
                full(wo_h), full(bo_p),
            ],
            out_specs=pl.BlockSpec((G * Lq, NHp), lambda i: (i, 0)),
        ),
        compiler_params=pltpu.CompilerParams(
            dimension_semantics=("parallel",),
            vmem_limit_bytes=int(vmem_limit)),
    )(q2, k2, v2, wq_s, bq_s, wk, bk, wo_h, bo_p)

    out = out_pad[:, :nhidden] if NHp != nhidden else out_pad
    return out.reshape(B, Lq, nhidden)


# ---------------------------------------------------------------------------
# Pure-JAX reference + param init + self-test
# ---------------------------------------------------------------------------
def _reference(query, key, value, params, *, num_heads):
    """Pure-JAX reference mirroring the PyTorch forward (mask/dropout = None)."""
    wq, bq, wk, bk, wo, bo = params
    B, Lq, E = query.shape
    _, Lk, D = value.shape
    d_k = E // num_heads
    Q = (query @ wq + bq).reshape(B, Lq, num_heads, d_k).transpose(0, 2, 1, 3)
    K = (key @ wk + bk).reshape(B, Lk, num_heads, d_k).transpose(0, 2, 1, 3)
    scores = jnp.einsum("bhqd,bhkd->bhqk", Q, K) / math.sqrt(d_k)
    p = jax.nn.softmax(scores, axis=-1)
    x = jnp.einsum("bhqk,bkd->bhqd", p, value)            # (B, h, Lq, D)
    x = x.transpose(0, 2, 1, 3).reshape(B, Lq, num_heads * D)
    return x @ wo + bo


def init_params(key, *, input_dim, nhidden, embed_time, num_heads, dtype=jnp.float32):
    """Deterministic parameter init; weights stored as (in_features, out_features)."""
    ks = jax.random.split(key, 6)

    def lin(kw, kb, fan_in, fan_out):
        bound = 1.0 / math.sqrt(fan_in)
        w = jax.random.uniform(kw, (fan_in, fan_out), dtype, -bound, bound)
        b = jax.random.uniform(kb, (1, fan_out), dtype, -bound, bound)
        return w, b

    wq, bq = lin(ks[0], ks[1], embed_time, embed_time)
    wk, bk = lin(ks[2], ks[3], embed_time, embed_time)
    wo, bo = lin(ks[4], ks[5], input_dim * num_heads, nhidden)
    return (wq, bq, wk, bk, wo, bo)


if __name__ == "__main__":
    # Small shapes consistent with the module's forward.
    B, Lq, Lk = 2, 16, 8
    input_dim, nhidden, embed_time, num_heads = 4, 32, 16, 2

    root = jax.random.PRNGKey(0)
    kq, kk, kv, kp = jax.random.split(root, 4)
    query = jax.random.normal(kq, (B, Lq, embed_time), jnp.float32)
    key = jax.random.normal(kk, (B, Lk, embed_time), jnp.float32)
    value = jax.random.normal(kv, (B, Lk, input_dim), jnp.float32)
    params = init_params(kp, input_dim=input_dim, nhidden=nhidden,
                         embed_time=embed_time, num_heads=num_heads)

    out = multi_time_attention(query, key, value, params, num_heads=num_heads)
    out = jax.block_until_ready(out)

    ref = _reference(query, key, value, params, num_heads=num_heads)
    assert out.shape == (B, Lq, nhidden)
    assert jnp.allclose(out, ref, atol=2e-3, rtol=2e-3), "mismatch vs JAX reference"

    print("KERNEL_OK")
</pallas_src>

<mosaic_0001>
module attributes {stable_mosaic.version = 11 : i64} {
  func.func @_mtan_kernel(%arg0: i32, %arg1: memref<16x16xf32, #tpu.memory_space<vmem>>, %arg2: memref<8x16xf32, #tpu.memory_space<vmem>>, %arg3: memref<8x4xf32, #tpu.memory_space<vmem>>, %arg4: memref<16x16xf32, #tpu.memory_space<vmem>>, %arg5: memref<1x16xf32, #tpu.memory_space<vmem>>, %arg6: memref<16x16xf32, #tpu.memory_space<vmem>>, %arg7: memref<1x16xf32, #tpu.memory_space<vmem>>, %arg8: memref<2x4x128xf32, #tpu.memory_space<vmem>>, %arg9: memref<1x128xf32, #tpu.memory_space<vmem>>, %arg10: memref<16x128xf32, #tpu.memory_space<vmem>>) attributes {dimension_semantics = [#tpu.dimension_semantics<parallel>], iteration_bounds = array<i64: 2>, scalar_prefetch = 0 : i64, scratch_operands = 0 : i64, tpu.core_type = #tpu.core_type<tc>, window_params = [{transform_indices = @transform_0, window_bounds = array<i64: 16, 16>}, {transform_indices = @transform_1, window_bounds = array<i64: 8, 16>}, {transform_indices = @transform_2, window_bounds = array<i64: 8, 4>}, {pipeline_mode = #tpu.pipeline_mode<synchronous>, transform_indices = @transform_3, window_bounds = array<i64: 16, 16>}, {pipeline_mode = #tpu.pipeline_mode<synchronous>, transform_indices = @transform_4, window_bounds = array<i64: 1, 16>}, {pipeline_mode = #tpu.pipeline_mode<synchronous>, transform_indices = @transform_5, window_bounds = array<i64: 16, 16>}, {pipeline_mode = #tpu.pipeline_mode<synchronous>, transform_indices = @transform_6, window_bounds = array<i64: 1, 16>}, {pipeline_mode = #tpu.pipeline_mode<synchronous>, transform_indices = @transform_7, window_bounds = array<i64: 2, 4, 128>}, {pipeline_mode = #tpu.pipeline_mode<synchronous>, transform_indices = @transform_8, window_bounds = array<i64: 1, 128>}, {transform_indices = @transform_9, window_bounds = array<i64: 16, 128>}]} {
    %c0 = arith.constant 0 : index
    %c0_0 = arith.constant 0 : index
    %0 = vector.load %arg1[%c0, %c0_0] : memref<16x16xf32, #tpu.memory_space<vmem>>, vector<16x16xf32>
    %c0_1 = arith.constant 0 : index
    %c0_2 = arith.constant 0 : index
    %1 = vector.load %arg2[%c0_1, %c0_2] : memref<8x16xf32, #tpu.memory_space<vmem>>, vector<8x16xf32>
    %c0_3 = arith.constant 0 : index
    %c0_4 = arith.constant 0 : index
    %2 = vector.load %arg3[%c0_3, %c0_4] : memref<8x4xf32, #tpu.memory_space<vmem>>, vector<8x4xf32>
    %c0_5 = arith.constant 0 : index
    %c0_6 = arith.constant 0 : index
    %3 = vector.load %arg4[%c0_5, %c0_6] : memref<16x16xf32, #tpu.memory_space<vmem>>, vector<16x16xf32>
    %cst = arith.constant dense<0.000000e+00> : vector<16x16xf32>
    %4 = tpu.matmul %0, %3, %cst {dimension_numbers = #tpu.dot_dimension_numbers<[1], [0], [0], [1], [0, 0, 1, 1], [], []>} : vector<16x16xf32>, vector<16x16xf32>, vector<16x16xf32> -> vector<16x16xf32>
    %c0_7 = arith.constant 0 : index
    %c0_8 = arith.constant 0 : index
    %5 = vector.load %arg5[%c0_7, %c0_8] : memref<1x16xf32, #tpu.memory_space<vmem>>, vector<1x16xf32>
    %6 = vector.broadcast %5 : vector<1x16xf32> to vector<16x16xf32>
    %7 = arith.addf %4, %6 : vector<16x16xf32>
    %c0_9 = arith.constant 0 : index
    %c0_10 = arith.constant 0 : index
    %8 = vector.load %arg6[%c0_9, %c0_10] : memref<16x16xf32, #tpu.memory_space<vmem>>, vector<16x16xf32>
    %cst_11 = arith.constant dense<0.000000e+00> : vector<8x16xf32>
    %9 = tpu.matmul %1, %8, %cst_11 {dimension_numbers = #tpu.dot_dimension_numbers<[1], [0], [0], [1], [0, 0, 1, 1], [], []>} : vector<8x16xf32>, vector<16x16xf32>, vector<8x16xf32> -> vector<8x16xf32>
    %c0_12 = arith.constant 0 : index
    %c0_13 = arith.constant 0 : index
    %10 = vector.load %arg7[%c0_12, %c0_13] : memref<1x16xf32, #tpu.memory_space<vmem>>, vector<1x16xf32>
    %11 = vector.broadcast %10 : vector<1x16xf32> to vector<8x16xf32>
    %12 = arith.addf %9, %11 : vector<8x16xf32>
    %cst_14 = arith.constant 0.000000e+00 : f32
    %13 = vector.broadcast %cst_14 : f32 to vector<1x16x128xf32>
    %14 = vector.extract_strided_slice %7 {offsets = [0, 0], sizes = [16, 8], strides = [1, 1]} : vector<16x16xf32> to vector<16x8xf32>
    %15 = vector.shape_cast %14 : vector<16x8xf32> to vector<1x16x8xf32>
    %16 = vector.extract_strided_slice %12 {offsets = [0, 0], sizes = [8, 8], strides = [1, 1]} : vector<8x16xf32> to vector<8x8xf32>
    %17 = vector.shape_cast %16 : vector<8x8xf32> to vector<1x8x8xf32>
    "tpu.trace_start"() <{level = 10 : i32, message = "gqd,gkd->gqk"}> : () -> ()
    %cst_15 = arith.constant dense<0.000000e+00> : vector<1x16x8xf32>
    %18 = tpu.matmul %15, %17, %cst_15 {dimension_numbers = #tpu.dot_dimension_numbers<[2], [2], [1], [1], [0, 0, 0, 1, 1, 1], [0], [0]>} : vector<1x16x8xf32>, vector<1x8x8xf32>, vector<1x16x8xf32> -> vector<1x16x8xf32>
    "tpu.trace_stop"() : () -> ()
    %cst_16 = arith.constant dense<0xFF800000> : vector<1x16xf32>
    %19 = vector.multi_reduction <maximumf>, %18, %cst_16 [2] : vector<1x16x8xf32> to vector<1x16xf32>
    %20 = vector.shape_cast %19 : vector<1x16xf32> to vector<1x16x1xf32>
    %21 = vector.broadcast %20 : vector<1x16x1xf32> to vector<1x16x8xf32>
    %22 = arith.subf %18, %21 : vector<1x16x8xf32>
    %23 = math.exp %22 : vector<1x16x8xf32>
    %cst_17 = arith.constant dense<0.000000e+00> : vector<1x16xf32>
    %24 = vector.multi_reduction <add>, %23, %cst_17 [2] : vector<1x16x8xf32> to vector<1x16xf32>
    %25 = vector.shape_cast %24 : vector<1x16xf32> to vector<1x16x1xf32>
    %26 = tpu.reciprocal %25 {approx = true} : vector<1x16x1xf32> -> vector<1x16x1xf32>
    %27 = arith.mulf %25, %26 : vector<1x16x1xf32>
    %cst_18 = arith.constant 2.000000e+00 : f32
    %28 = vector.broadcast %cst_18 : f32 to vector<1x16x1xf32>
    %29 = arith.subf %28, %27 : vector<1x16x1xf32>
    %30 = arith.mulf %26, %29 : vector<1x16x1xf32>
    %31 = vector.broadcast %30 : vector<1x16x1xf32> to vector<1x16x8xf32>
    %32 = arith.mulf %23, %31 : vector<1x16x8xf32>
    %c0_19 = arith.constant 0 : index
    %c0_20 = arith.constant 0 : index
    %c0_21 = arith.constant 0 : index
    %33 = vector.load %arg8[%c0_19, %c0_20, %c0_21] : memref<2x4x128xf32, #tpu.memory_space<vmem>>, vector<1x4x128xf32>
    %34 = vector.shape_cast %33 : vector<1x4x128xf32> to vector<4x128xf32>
    %cst_22 = arith.constant dense<0.000000e+00> : vector<8x128xf32>
    %35 = tpu.matmul %2, %34, %cst_22 {dimension_numbers = #tpu.dot_dimension_numbers<[1], [0], [0], [1], [0, 0, 1, 1], [], []>} : vector<8x4xf32>, vector<4x128xf32>, vector<8x128xf32> -> vector<8x128xf32>
    %36 = vector.shape_cast %35 : vector<8x128xf32> to vector<1x8x128xf32>
    "tpu.trace_start"() <{level = 10 : i32, message = "gqk,gkn->gqn"}> : () -> ()
    %cst_23 = arith.constant dense<0.000000e+00> : vector<1x16x128xf32>
    %37 = tpu.matmul %32, %36, %cst_23 {dimension_numbers = #tpu.dot_dimension_numbers<[2], [1], [1], [2], [0, 0, 0, 1, 1, 2], [0], [0]>} : vector<1x16x8xf32>, vector<1x8x128xf32>, vector<1x16x128xf32> -> vector<1x16x128xf32>
    "tpu.trace_stop"() : () -> ()
    %38 = arith.addf %13, %37 : vector<1x16x128xf32>
    %39 = vector.extract_strided_slice %7 {offsets = [0, 8], sizes = [16, 8], strides = [1, 1]} : vector<16x16xf32> to vector<16x8xf32>
    %40 = vector.shape_cast %39 : vector<16x8xf32> to vector<1x16x8xf32>
    %41 = vector.extract_strided_slice %12 {offsets = [0, 8], sizes = [8, 8], strides = [1, 1]} : vector<8x16xf32> to vector<8x8xf32>
    %42 = vector.shape_cast %41 : vector<8x8xf32> to vector<1x8x8xf32>
    "tpu.trace_start"() <{level = 10 : i32, message = "gqd,gkd->gqk"}> : () -> ()
    %cst_24 = arith.constant dense<0.000000e+00> : vector<1x16x8xf32>
    %43 = tpu.matmul %40, %42, %cst_24 {dimension_numbers = #tpu.dot_dimension_numbers<[2], [2], [1], [1], [0, 0, 0, 1, 1, 1], [0], [0]>} : vector<1x16x8xf32>, vector<1x8x8xf32>, vector<1x16x8xf32> -> vector<1x16x8xf32>
    "tpu.trace_stop"() : () -> ()
    %cst_25 = arith.constant dense<0xFF800000> : vector<1x16xf32>
    %44 = vector.multi_reduction <maximumf>, %43, %cst_25 [2] : vector<1x16x8xf32> to vector<1x16xf32>
    %45 = vector.shape_cast %44 : vector<1x16xf32> to vector<1x16x1xf32>
    %46 = vector.broadcast %45 : vector<1x16x1xf32> to vector<1x16x8xf32>
    %47 = arith.subf %43, %46 : vector<1x16x8xf32>
    %48 = math.exp %47 : vector<1x16x8xf32>
    %cst_26 = arith.constant dense<0.000000e+00> : vector<1x16xf32>
    %49 = vector.multi_reduction <add>, %48, %cst_26 [2] : vector<1x16x8xf32> to vector<1x16xf32>
    %50 = vector.shape_cast %49 : vector<1x16xf32> to vector<1x16x1xf32>
    %51 = tpu.reciprocal %50 {approx = true} : vector<1x16x1xf32> -> vector<1x16x1xf32>
    %52 = arith.mulf %50, %51 : vector<1x16x1xf32>
    %cst_27 = arith.constant 2.000000e+00 : f32
    %53 = vector.broadcast %cst_27 : f32 to vector<1x16x1xf32>
    %54 = arith.subf %53, %52 : vector<1x16x1xf32>
    %55 = arith.mulf %51, %54 : vector<1x16x1xf32>
    %56 = vector.broadcast %55 : vector<1x16x1xf32> to vector<1x16x8xf32>
    %57 = arith.mulf %48, %56 : vector<1x16x8xf32>
    %c1 = arith.constant 1 : index
    %c0_28 = arith.constant 0 : index
    %c0_29 = arith.constant 0 : index
    %58 = vector.load %arg8[%c1, %c0_28, %c0_29] : memref<2x4x128xf32, #tpu.memory_space<vmem>>, vector<1x4x128xf32>
    %59 = vector.shape_cast %58 : vector<1x4x128xf32> to vector<4x128xf32>
    %cst_30 = arith.constant dense<0.000000e+00> : vector<8x128xf32>
    %60 = tpu.matmul %2, %59, %cst_30 {dimension_numbers = #tpu.dot_dimension_numbers<[1], [0], [0], [1], [0, 0, 1, 1], [], []>} : vector<8x4xf32>, vector<4x128xf32>, vector<8x128xf32> -> vector<8x128xf32>
    %61 = vector.shape_cast %60 : vector<8x128xf32> to vector<1x8x128xf32>
    "tpu.trace_start"() <{level = 10 : i32, message = "gqk,gkn->gqn"}> : () -> ()
    %cst_31 = arith.constant dense<0.000000e+00> : vector<1x16x128xf32>
    %62 = tpu.matmul %57, %61, %cst_31 {dimension_numbers = #tpu.dot_dimension_numbers<[2], [1], [1], [2], [0, 0, 0, 1, 1, 2], [0], [0]>} : vector<1x16x8xf32>, vector<1x8x128xf32>, vector<1x16x128xf32> -> vector<1x16x128xf32>
    "tpu.trace_stop"() : () -> ()
    %63 = arith.addf %38, %62 : vector<1x16x128xf32>
    %64 = vector.shape_cast %63 : vector<1x16x128xf32> to vector<16x128xf32>
    %c0_32 = arith.constant 0 : index
    %c0_33 = arith.constant 0 : index
    %65 = vector.load %arg9[%c0_32, %c0_33] : memref<1x128xf32, #tpu.memory_space<vmem>>, vector<1x128xf32>
    %66 = vector.broadcast %65 : vector<1x128xf32> to vector<16x128xf32>
    %67 = arith.addf %64, %66 : vector<16x128xf32>
    %c0_34 = arith.constant 0 : index
    %c0_35 = arith.constant 0 : index
    %68 = vector.load %arg10[%c0_34, %c0_35] : memref<16x128xf32, #tpu.memory_space<vmem>>, vector<16x128xf32>
    tpu.vector_store %arg10[%c0_34, %c0_35], %67 {strides = array<i32>} : memref<16x128xf32, #tpu.memory_space<vmem>>, vector<16x128xf32>,
    return
  }
  func.func @transform_0(%arg0: i32) -> (i32, i32) {
    %c0_i32 = arith.constant 0 : i32
    %c0_i32_0 = arith.constant 0 : i32
    return %arg0, %c0_i32 : i32, i32
  }
  func.func @transform_1(%arg0: i32) -> (i32, i32) {
    %c0_i32 = arith.constant 0 : i32
    %c0_i32_0 = arith.constant 0 : i32
    return %arg0, %c0_i32 : i32, i32
  }
  func.func @transform_2(%arg0: i32) -> (i32, i32) {
    %c0_i32 = arith.constant 0 : i32
    %c0_i32_0 = arith.constant 0 : i32
    return %arg0, %c0_i32 : i32, i32
  }
  func.func @transform_3(%arg0: i32) -> (i32, i32) {
    %c0_i32 = arith.constant 0 : i32
    %c0_i32_0 = arith.constant 0 : i32
    %c0_i32_1 = arith.constant 0 : i32
    return %c0_i32, %c0_i32_0 : i32, i32
  }
  func.func @transform_4(%arg0: i32) -> (i32, i32) {
    %c0_i32 = arith.constant 0 : i32
    %c0_i32_0 = arith.constant 0 : i32
    %c0_i32_1 = arith.constant 0 : i32
    return %c0_i32, %c0_i32_0 : i32, i32
  }
  func.func @transform_5(%arg0: i32) -> (i32, i32) {
    %c0_i32 = arith.constant 0 : i32
    %c0_i32_0 = arith.constant 0 : i32
    %c0_i32_1 = arith.constant 0 : i32
    return %c0_i32, %c0_i32_0 : i32, i32
  }
  func.func @transform_6(%arg0: i32) -> (i32, i32) {
    %c0_i32 = arith.constant 0 : i32
    %c0_i32_0 = arith.constant 0 : i32
    %c0_i32_1 = arith.constant 0 : i32
    return %c0_i32, %c0_i32_0 : i32, i32
  }
  func.func @transform_7(%arg0: i32) -> (i32, i32, i32) {
    %c0_i32 = arith.constant 0 : i32
    %c0_i32_0 = arith.constant 0 : i32
    %c0_i32_1 = arith.constant 0 : i32
    %c0_i32_2 = arith.constant 0 : i32
    return %c0_i32, %c0_i32_0, %c0_i32_1 : i32, i32, i32
  }
  func.func @transform_8(%arg0: i32) -> (i32, i32) {
    %c0_i32 = arith.constant 0 : i32
    %c0_i32_0 = arith.constant 0 : i32
    %c0_i32_1 = arith.constant 0 : i32
    return %c0_i32, %c0_i32_0 : i32, i32
  }
  func.func @transform_9(%arg0: i32) -> (i32, i32) {
    %c0_i32 = arith.constant 0 : i32
    %c0_i32_0 = arith.constant 0 : i32
    return %arg0, %c0_i32 : i32, i32
  }
}

</mosaic_0001>

<bundles_post_ra>
// kernel: tpu_custom_call.1
= control target key start
LH: loop header
LB: loop body
LE: loop exit
PB: predicated region body
PF: predicated region fallthrough
CT: control target
= control target key end

     0   :  { %s1220_s0 = inlined_call_operand.vmem [shape: f32[32,16], index: 0, kind: input, shape index: {}]   ;;  %s1221_s1 = inlined_call_operand.vmem [shape: f32[16,16], index: 1, kind: input, shape index: {}]   ;;  %s1222_s2 = inlined_call_operand.vmem [shape: f32[16,4], index: 2, kind: input, shape index: {}]   ;;  %s1223_s3 = inlined_call_operand.vmem [shape: f32[16,16], index: 3, kind: input, shape index: {}]   ;;  %s1224_s4 = inlined_call_operand.hbm [shape: f32[1,16], index: 4, kind: input, shape index: {}]   ;;  %s1225_s5 = inlined_call_operand.vmem [shape: f32[16,16], index: 5, kind: input, shape index: {}]   ;;  %s1226_s6 = inlined_call_operand.vmem [shape: f32[1,16], index: 6, kind: input, shape index: {}]   ;;  %s1227_s7 = inlined_call_operand.vmem [shape: f32[2,4,128], index: 7, kind: input, shape index: {}]   ;;  %s1228_s8 = inlined_call_operand.vmem [shape: f32[1,128], index: 8, kind: input, shape index: {}]   ;;  %s1229_s9 = inlined_call_operand.hbm [shape: f32[32,128], index: 9, kind: output, shape index: {}]  }
   0x1   :  { %1233 = sst [smem:[#allocation11_spill]] %s1224_s4 }
   0x2   :  { %14 = vsyncpa [#allocation3], 0 }
   0x3   :  { %15 = vsyncpa [#allocation4], 0 }
   0x4   :  { %17 = vsyncpa [#allocation4 + $0x1], 0  ;;  %s1071_s30 = smov 0   ;;  %s1073_s10 = smov 0  }
   0x5   :  { %s1075_s11 = smov 0   ;;  %s1077_s12 = smov 0  }
   0x6 LB: > { %1234 = sst [smem:[#allocation8_spill]] %s1011_s11  ;;  %s1092_s13 = sadd.s32 4294967295, %s1015_s12   ;;  %s1015_s12 = sphi %s1077_s12, %s1240_s12   ;;  %s1011_s11 = sphi %s1075_s11, %s1242_s11   ;;  %s1007_s10 = sphi %s1073_s10, %s1244_s10   ;;  %s1003_s30 = sphi %s1071_s30, %s1243_s30  }
   0x7   : > { %s810_s14 = sadd.s32 4294967294, %s1015_s12   ;;  %s1096_s15 = sadd.s32 1, %s1015_s12  }
   0x8   : > { %1235 = sst [smem:[#allocation9_spill]] %s1096_s15  ;;  %s234_s16 = sadd.s32 1, %s1011_s11 }
   0x9   : > { %s231_s17 = ssub.s32 %s1015_s12, %s1096_s15  ;;  %p244_p0 = scmp.ne.s32.totalorder %s1011_s11, %s1007_s10 }
   0xa   : > { %p232_p1 = scmp.eq.s32.totalorder %s231_s17, 0  ;;  %p245_p2 = scmp.eq.s32.totalorder %s1092_s13, 1 }
   0xb   : > { %p250_p3 = scmp.ne.s32.totalorder %s1007_s10, %s1003_s30  ;;  %p251_p4 = scmp.eq.s32.totalorder %s810_s14, 1 }
   0xc   : > { %s1107_s18 = scalar_select %p232_p1, %s1011_s11, %s234_s16  }
   0xd   : > { %p1109_p5 = por %p245_p2, %p244_p0  ;;  %p1113_p6 = por %p251_p4, %p250_p3 }
   0xe   : > { %1236 = sst [smem:[#allocation10_spill]] %s1107_s18  ;;  %p811_p7 = scmp.ge.s32.totalorder %s1015_s12, 1 }
   0xf   : > { %p258_p8 = scmp.lt.s32.totalorder %s1015_s12, 3  ;;  %p861_p9 = scmp.eq.s32.totalorder %s1092_s13, 0 }
  0x10   : > { %s1239_s4 = sld [smem:[#allocation11_spill]]  ;;  %s1017_s24 = smov [#allocation2]  }
  0x11   : > { %p259_p10 = pnand %p811_p7, %p258_p8  ;;  %s275_s25 = sshll.u32 %s1017_s24, 4  ;;  %s276_s25 = int_to_ptr.vmem [resolvable:$true] %s275_s25 }
  0x13   : > { %p853_p11 = pneg %p259_p10  ;;  %323 = sbr.rel (%p259_p10) target bundleno = 833 (0x341), region = 56 }
  0x15   : > { %p854_p12 = pnand %p861_p9, %p853_p11 }
  0x16   : > { %s273_s23 = sshll.u32 %s1239_s4, 4  ;;  %s274_s23 = int_to_ptr.hbm [resolvable:$true] %s273_s23 }
  0x17   : > { %856 = dma.hbm_to_vmem [thread:$0]  (!%p854_p12), %s274_s23, 16, %s276_s25, [#allocation3]  }
  0x18   : > { %994 = dma.done.wait (%p861_p9), [#allocation3], 16  }
  0x19   : > { %996 = vsyncadd (%p861_p9), [#allocation3], 4294967280  ;;  %p374_p13 = scmp.lt.s32.totalorder %s1092_s13, 1  ;;  %s817_s26 = sshll.u32 %s1092_s13, 1  ;;  %v424_v0 = vld [vmem:[%s1225_s5 + $0x8] sm:$0xff]  ;;  %v423_v1 = vld [vmem:[%s1225_s5] sm:$0xff] }
  0x1a   : > { %p369_p0 = scmp.lt.s32.totalorder %s817_s26, 3  ;;  %v388_v2 = vld [vmem:[%s1223_s3 + $0x8] sm:$0xff]  ;;  %446 = vmatpush.msra.mxu1 %v424_v0  ;;  %vm393_vm0 = vcmask 130048   ;;  %v387_v4 = vld [vmem:[%s1223_s3] sm:$0xff]  ;;  %vm518_vm1 = vcmask 1043456   ;;  %vm452_vm2 = vcmask 64512  }
  0x1b   : > { %s1126_s27 = scalar_select %p374_p13, %s1092_s13, 1  ;;  %414 = vmatpush.msra.mxu0 %v388_v2  ;;  %845 = vmatpush.msra.mxu2 %v388_v2  ;;  %v513_v7 = vld [vmem:[%s1227_s7] sm:$0xf]  ;;  %vm514_vm3 = vcmask 31744   ;;  %v832_v34 = vld [vmem:[%s1227_s7 + $0x4] sm:$0xf] }
  0x1c   : > { %s1246_s26 = smov (!%p369_p0, %s817_s26), 3  ;;  %447 = vmatpush.msra.mxu1 %v423_v1  ;;  %827 = vmatpush.msk.msra.mxu3 %vm518_vm1, %v513_v7  ;;  %v900_v8 = vld [vmem:[%s1226_s6] ss:$0 sm:$0xff]  ;;  %s1018_s14 = smov 120  }
  0x1d   : > { %s819_s28 = sshll.u32 %s1126_s27, 3  ;;  %s818_s17 = sshll.u32 %s1246_s26, 3  ;;  %415 = vmatpush.msra.mxu0 %v387_v4  ;;  %846 = vmatpush.msra.mxu2 %v387_v4  ;;  %v901_v9 = vld [vmem:[#allocation2] ss:$0 sm:$0xff] }
  0x1e   : > { %s377_s16 = scalar_lea.vmem %s1221_s1, %s819_s28  ;;  %s372_s23 = scalar_lea.vmem %s1220_s0, %s818_s17 }
  0x1f   : > { %v385_v3 = vld [vmem:[%s377_s16] sm:$0xff]  ;;  %v384_v6 = vld [vmem:[%s372_s23 + $0x8] sm:$0xff]  ;;  %s381_s21 = scalar_lea.vmem %s1222_s2, %s819_s28  ;;  %s365_s22 = sand.u32 1, %s1007_s10  }
  0x20   : > { %v383_v5 = vld [vmem:[%s372_s23] sm:$0xff]  ;;  %823 = vmatmul.msk.f32.vlgmr.msra.gmra.mxu1 %vm393_vm0, %v385_v3  ;;  %822 = vmatmul.msk.f32.vlgmr.msra.gmra.mxu2 %vm393_vm0, %v384_v6  ;;  %s816_s23 = sshll.u32 %s365_s22, 4  ;;  %s844_s26 = sshll.u32 %s1092_s13, 4 }
  0x21   : > { %821 = vmatmul.msk.f32.vlgmr.msra.gmra.mxu0 %vm393_vm0, %v383_v5  ;;  %v386_v16 = vld [vmem:[%s381_s21] sm:$0xff]  ;;  %s708_s11 = scalar_lea.hbm %s1229_s9, %s844_s26  ;;  %s367_s15 = scalar_lea.vmem [#allocation5], %s816_s23 }
  0x22   : > { %828 = vmatmul.msk.f32.vlgmr.msra.gmra.mxu3 %vm514_vm3, %v386_v16  ;;  %s709_s18 = sshll.u32 %s367_s15, 4  ;;  %s697_s16 = scalar_lea.sflag [#allocation4], %s365_s22  ;;  %s710_s18 = int_to_ptr.vmem [resolvable:$true] %s709_s18 }
  0x23   : > { %s969_s28 = scalar_lea.hbm %s1229_s9, 32 }
  0x9d   : > { %v449_v10 = vpop.f32.mrf.mxu1 }
  0x9e   : > { %v417_v11 = vpop.f32.mrf.mxu0  ;;  %v450_v12 = vadd.f32 %v900_v8, %v449_v10 }
  0x9f   : > { %v418_v13 = vadd.f32 %v901_v9, %v417_v11  ;;  %v902_v11 = vld [vmem:[%s1228_s8] ss:$0 sm:$0xff] }
  0xa0   : > { %546 = vrot.lane.b32.xlu0 %v450_v12, %s1018_s14  ;;  %824 = vmatpush.xpose.msk.msrb.mxu2 %vm452_vm2, %v450_v12 }
  0xa3   : > { %825 = vmatmul.msk.f32.vlgmr.msrb.gmra.mxu2 %vm452_vm2, %v418_v13  ;;  %v420_v14 = vpop.f32.mrf.mxu2 }
  0xa4   : > { %v421_v15 = vadd.f32 %v901_v9, %v420_v14 }
  0xa5   : > { %v539_v22 = vpop.f32.mrf.mxu3 }
  0xa6   : > { %544 = vrot.lane.b32.xlu1 %v421_v15, %s1018_s14  ;;  %680 = vmatpush.msrb.mxu1 %v539_v22 }
  0xa8   : > { %542 = vrot.lane.b32.xlu0 %v418_v13, %s1018_s14  ;;  %s711_s14 = sshll.u32 %s708_s11, 4  ;;  %s712_s14 = int_to_ptr.hbm [resolvable:$true] %s711_s14 }
  0xa9   : > { %s963_s17 = sshra.s32 %s712_s14, 4  ;;  %s964_s17 = int_to_ptr.hbm [resolvable:$true] %s963_s17 }
  0xaa   : > { %s965_s13 = scalar_lea.hbm %s964_s17, 16  ;;  %p970_p4 = scmp.lt.s32.totalorder %s964_s17, %s1229_s9 }
  0xab   : > { %826 = vmatmul.msk.f32.gmra.mxu2 %vm452_vm2, %v421_v15  ;;  %p966_p1 = scmp.ne.s32.totalorder %s964_s17, %s965_s13  ;;  %p971_p7 = scmp.lt.s32.totalorder %s969_s28, %s965_s13 }
  0xad   : > { %p967_p2 = pnand %p966_p1, %p1109_p5  ;;  %p972_p8 = por %p971_p7, %p970_p4 }
  0xaf   : > { %p968_p3 = pneg %p967_p2 }
  0xb1   : > { %p973_p9 = pnand %p972_p8, %p968_p3 }
 0x112   : > { %v547_v17 = vpop.permute.xlu0 %546 }
 0x113   : > { %829 = vmatpush.xpose.msk.msrb.mxu3 %vm452_vm2, %v547_v17 }
 0x117   : > { %833 = vmatpush.msk.msra.mxu3 %vm518_vm1, %v832_v34 }
 0x118   : > { %v545_v19 = vpop.permute.xlu1 %544 }
 0x11a   : > { %v543_v18 = vpop.permute.xlu0 %542 }
 0x11b   : > { %830 = vmatmul.msk.f32.vlgmr.msrb.gmra.mxu3 %vm452_vm2, %v543_v18 }
 0x123   : > { %831 = vmatmul.msk.f32.gmra.mxu3 %vm452_vm2, %v545_v19 }
 0x126   : > { %v479_v20 = vpop.f32.mrf.mxu2 }
 0x127   : > { %v485_v21 = vsel %vm452_vm2, %v479_v20, -inf }
 0x128   : > { %486 = vmax.xlane.f32.xlu1 %v485_v21 }
 0x12b   : > { %834 = vmatmul.msk.f32.vlgmr.msra.gmra.mxu3 %vm514_vm3, %v386_v16 }
 0x12e   : > { %v482_v28 = vpop.f32.mrf.mxu2 }
 0x12f   : > { %v488_v31 = vsel %vm452_vm2, %v482_v28, -inf }
 0x19b   : > { %v487_v23 = vpop.xlane.xlu1 %486 }
 0x19c   : > { %v491_v24 = vsub.f32 %v479_v20, %v487_v23 }
 0x19e   : > { %v571_v25 = vpop.f32.mrf.mxu3  ;;  %v493_v27 = vmul.f32 1.442695, %v491_v24 }
 0x19f   : > { %v577_v26 = vsel %vm452_vm2, %v571_v25, -inf }
 0x1a0   : > { %578 = vmax.xlane.f32.xlu2 %v577_v26  ;;  %903 = vpow2.f32 %v493_v27 }
 0x1a6   : > { %v574_v29 = vpop.f32.mrf.mxu3  ;;  %v904_v32 = vpop.eup %903 }
 0x1a7   : > { %v580_v30 = vsel %vm452_vm2, %v574_v29, -inf  ;;  %v497_v33 = vsel %vm452_vm2, %v904_v32, 0.0 }
 0x1a8   : > { %581 = vmax.xlane.f32.xlu0 %v580_v30  ;;  %489 = vmax.xlane.f32.xlu2 %v488_v31 }
 0x1ae   : > { %v627_v56 = vpop.f32.mrf.mxu3 }
 0x1af   : > { %651 = vmatpush.msrb.mxu0 %v627_v56 }
 0x1b0   : > { %498 = vadd.xlane.f32.xlu2 %v497_v33 }
 0x213   : > { %v579_v35 = vpop.xlane.xlu2 %578 }
 0x214   : > { %v583_v39 = vsub.f32 %v571_v25, %v579_v35 }
 0x216   : > { %v585_v40 = vmul.f32 1.442695, %v583_v39 }
 0x21b   : > { %v490_v36 = vpop.xlane.xlu2 %489  ;;  %v582_v42 = vpop.xlane.xlu0 %581 }
 0x21c   : > { %v492_v37 = vsub.f32 %v482_v28, %v490_v36  ;;  %v584_v44 = vsub.f32 %v574_v29, %v582_v42 }
 0x21e   : > { %v495_v38 = vmul.f32 1.442695, %v492_v37  ;;  %v587_v47 = vmul.f32 1.442695, %v584_v44 }
 0x220   : > { %905 = vpow2.f32 %v495_v38 }
 0x223   : > { %v499_v41 = vpop.xlane.xlu2 %498 }
 0x224   : > { %907 = vrcp.f32 %v499_v41 }
 0x225   : > { %909 = vpow2.f32 %v585_v40 }
 0x226   : > { %v906_v43 = vpop.eup %905  ;;  %911 = vpow2.f32 %v587_v47 }
 0x227   : > { %v500_v45 = vsel %vm452_vm2, %v906_v43, 0.0 }
 0x228   : > { %501 = vadd.xlane.f32.xlu2 %v500_v45 }
 0x22a   : > { %v908_v46 = vpop.eup %907 }
 0x22b   : > { %v505_v48 = vmul.f32 %v908_v46, %v499_v41  ;;  %v910_v49 = vpop.eup %909 }
 0x22c   : > { %v589_v52 = vsel %vm452_vm2, %v910_v49, 0.0  ;;  %v912_v54 = vpop.eup %911 }
 0x22d   : > { %v507_v50 = vsub.f32 2.0, %v505_v48  ;;  %v592_v55 = vsel %vm452_vm2, %v912_v54, 0.0 }
 0x22f   : > { %v509_v51 = vmul.f32 %v908_v46, %v507_v50 }
 0x230   : > { %590 = vadd.xlane.f32.xlu2 %v589_v52 }
 0x231   : > { %v511_v53 = vmul.f32 %v904_v32, %v509_v51 }
 0x233   : > { %837 = vmatmul.msk.f32.vlgmr.msrb.gmra.mxu1 %vm452_vm2, %v511_v53 }
 0x238   : > { %593 = vadd.xlane.f32.xlu2 %v592_v55 }
 0x29b   : > { %v502_v57 = vpop.xlane.xlu2 %501 }
 0x29c   : > { %913 = vrcp.f32 %v502_v57 }
 0x2a2   : > { %v914_v58 = vpop.eup %913 }
 0x2a3   : > { %v506_v59 = vmul.f32 %v914_v58, %v502_v57  ;;  %v591_v60 = vpop.xlane.xlu2 %590 }
 0x2a4   : > { %915 = vrcp.f32 %v591_v60 }
 0x2a5   : > { %v508_v61 = vsub.f32 2.0, %v506_v59 }
 0x2a7   : > { %v510_v62 = vmul.f32 %v914_v58, %v508_v61 }
 0x2a9   : > { %v512_v63 = vmul.f32 %v906_v43, %v510_v62 }
 0x2aa   : > { %v916_v0 = vpop.eup %915 }
 0x2ab   : > { %v597_v1 = vmul.f32 %v916_v0, %v591_v60  ;;  %838 = vmatmul.msk.f32.gmra.mxu1 %vm452_vm2, %v512_v63  ;;  %v594_v2 = vpop.xlane.xlu2 %593 }
 0x2ac   : > { %917 = vrcp.f32 %v594_v2 }
 0x2ad   : > { %v599_v3 = vsub.f32 2.0, %v597_v1 }
 0x2af   : > { %v601_v4 = vmul.f32 %v916_v0, %v599_v3 }
 0x2b0   : > { %v682_v12 = vpop.f32.mrf.mxu1 }
 0x2b1   : > { %v603_v5 = vmul.f32 %v910_v49, %v601_v4 }
 0x2b2   : > { %v918_v6 = vpop.eup %917 }
 0x2b3   : > { %v598_v7 = vmul.f32 %v918_v6, %v594_v2  ;;  %835 = vmatmul.msk.f32.vlgmr.msrb.gmra.mxu0 %vm452_vm2, %v603_v5 }
 0x2b5   : > { %v600_v8 = vsub.f32 2.0, %v598_v7 }
 0x2b7   : > { %v602_v9 = vmul.f32 %v918_v6, %v600_v8 }
 0x2b9   : > { %v604_v10 = vmul.f32 %v912_v54, %v602_v9 }
 0x2bb   : > { %836 = vmatmul.msk.f32.gmra.mxu0 %vm452_vm2, %v604_v10 }
 0x328   : > { %v685_v16 = vpop.f32.mrf.mxu1 }
 0x330   : > { %v653_v13 = vpop.f32.mrf.mxu0 }
 0x331   : > { %v683_v14 = vadd.f32 %v682_v12, %v653_v13 }
 0x333   : > { %v692_v15 = vadd.f32 %v902_v11, %v683_v14 }
 0x335   : > { %694 = vst [vmem:[%s367_s15] sm:$0xff] %v692_v15 }
 0x338   : > { %v656_v17 = vpop.f32.mrf.mxu0 }
 0x339   : > { %v686_v18 = vadd.f32 %v685_v16, %v656_v17 }
 0x33b   : > { %v693_v19 = vadd.f32 %v902_v11, %v686_v18 }
 0x33d   : > { %695 = vst [vmem:[%s367_s15 + $0x8] sm:$0xff] %v693_v19 }
 0x33e   : > { %976 = shalt.err (!%p973_p9)
}
 0x33f   : > { %s1019_s22 = smov 128   ;;  %s1020_s25 = smov 8  }
 0x340   : > { %851 = dma.vmem_to_hbm [thread:$0]  (%p1109_p5), %s710_s18, 256, %s712_s14, %s697_s16, %s1019_s22, %s1019_s22, %s1020_s25  }
 0x341 PF: > { %p863_p10 = scmp.ge.s32.totalorder %s1015_s12, 2  ;;  %s726_s26 = sand.u32 1, %s1003_s30  }
 0x342   : > { %s727_s29 = scalar_lea.sflag [#allocation4], %s726_s26 }
 0x343   : > { %p858_p11 = pnand %p863_p10, %p1113_p6 }
 0x345   : > { %p859_p12 = pneg %p858_p11 }
 0x347   : > { %998 = dma.done.wait (%p859_p12), %s727_s29, 256  }
 0x348   : > { %1000 = vsyncadd (%p859_p12), %s727_s29, 4294967040  ;;  %s1240_s12 = sld [smem:[#allocation9_spill]]  ;;  %s1243_s30 = smov %s1007_s10 }
 0x349   : > { %s1241_s4 = sld [smem:[#allocation8_spill]] }
 0x34a   : > { %s1242_s11 = sld [smem:[#allocation10_spill]] }
 0x34e   : > { %p20_p13 = scmp.ge.s32.totalorder %s1240_s12, 4  }
 0x34f   : > { %s1244_s10 = smov %s1241_s4 }
 0x350   :  { %22 = sbr.rel (!%p20_p13) target bundleno = 6 (0x6), region = 103 }
 0x355   :  { %733 = vsyncpa [#allocation3], 1 }
 0x356   :  { %735 = vsyncpa [#allocation3 + $0x1], 1 }
 0x357   :  { %736 = vsyncpa [#allocation4], 1 }
 0x358   :  { %738 = vsyncpa [#allocation4 + $0x1], 1 }

</bundles_post_ra>
